<compile_context>
chip_gen: v7x
topology: tpu7x:2x2x1
jax: 0.10.0
libtpu: 0.0.40
codegen_flags: <defaults>
</compile_context>

<pallas_src>
import math

import jax
import jax.numpy as jnp
from jax.experimental import pallas as pl
from jax.experimental.pallas import tpu as pltpu


# ------------------------------------------------------------------ kernels ---

def _pe_add_kernel(x_ref, pe_ref, o_ref):
    # x_ref: (B, tile_s, D2), pe_ref: (tile_s, D2) -- broadcast add over batch.
    o_ref[...] = x_ref[...] + pe_ref[...][None, :, :]


def _pe_add_dropout_kernel(x_ref, pe_ref, scale_ref, o_ref):
    # scale_ref holds keep_mask / keep_prob in the compute dtype (0 where dropped):
    # single fused multiply implements inverted dropout.
    o_ref[...] = (x_ref[...] + pe_ref[...][None, :, :]) * scale_ref[...]


# ------------------------------------------------------------- layout helpers ---

def _choose_tile_rows(n_rows, row_bytes, target_bytes=2 << 20):
    """Largest divisor of n_rows whose tile is <= ~2 MiB; prefer multiples of 8."""
    max_rows = max(1, target_bytes // max(row_bytes, 1))
    best, best8 = 1, None
    for t in range(1, n_rows + 1):
        if n_rows % t == 0 and t <= max_rows:
            best = t
            if t % 8 == 0:
                best8 = t
    return best8 if best8 is not None else best


def _lane_dense_view(arr, seq, d_model):
    """Make the last dim a multiple of 128.

    Prefers folding `r` consecutive sequence rows into the lane axis (a free,
    contiguous reshape that preserves the add semantics since pe reshapes the
    same way); falls back to zero-padding d_model. Returns (arr2, S2, D2, mode).
    """
    r = 128 // math.gcd(d_model, 128)
    if r == 1:
        return arr, seq, d_model, "none"
    if seq % r == 0:
        s2, d2 = seq // r, d_model * r
        return arr.reshape(arr.shape[:-2] + (s2, d2)), s2, d2, "fold"
    d2 = ((d_model + 127) // 128) * 128
    pad = [(0, 0)] * (arr.ndim - 1) + [(0, d2 - d_model)]
    return jnp.pad(arr, pad), seq, d2, "pad"


# ----------------------------------------------------------------- wrapper ---

def positional_encoding_forward(x, pe, *, dropout_p=0.1, train=False,
                                keep_mask=None, rng_key=None, tile_s=None):
    """Forward of PositionalEncoding.

    x         : (S, B, D) array (seq_len, batch, d_model), float dtype.
    pe        : (max_len, D) precomputed sinusoidal table (float32).
    keep_mask : optional (S, B, D) bool mask for train-mode dropout; if None and
                train=True it is drawn from `rng_key` with keep prob 1 - dropout_p.
    """
    S, B, D = x.shape
    apply_dropout = bool(train) and dropout_p > 0.0
    keep_prob = 1.0 - dropout_p
    cdtype = x.dtype

    # (S, B, D) -> (B, S, D): seq rows on the sublane axis, d_model on lanes.
    x_t = jnp.transpose(x, (1, 0, 2))
    pe_s = pe[:S].astype(cdtype)                       # (S, D)

    x2, S2, D2, mode = _lane_dense_view(x_t, S, D)
    pe2, _, _, _ = _lane_dense_view(pe_s, S, D)

    if tile_s is None:
        row_bytes = B * D2 * x2.dtype.itemsize
        tile_s = _choose_tile_rows(S2, row_bytes)
    assert S2 % tile_s == 0, "tile_s must divide the (folded) sequence length"
    grid = (S2 // tile_s,)

    in_specs = [
        pl.BlockSpec((B, tile_s, D2), lambda i: (0, i, 0)),   # x tile
        pl.BlockSpec((tile_s, D2), lambda i: (i, 0)),         # pe tile (B-x smaller)
    ]
    inputs = [x2, pe2]

    if apply_dropout:
        if keep_mask is None:
            if rng_key is None:
                raise ValueError("train-mode dropout needs keep_mask or rng_key")
            keep_mask = jax.random.bernoulli(rng_key, keep_prob, (S, B, D))
        scale = keep_mask.astype(cdtype) * jnp.asarray(1.0 / keep_prob, dtype=cdtype)
        scale_t = jnp.transpose(scale, (1, 0, 2))
        scale2, _, _, _ = _lane_dense_view(scale_t, S, D)
        inputs.append(scale2)
        in_specs.append(pl.BlockSpec((B, tile_s, D2), lambda i: (0, i, 0)))
        kernel = _pe_add_dropout_kernel
    else:
        kernel = _pe_add_kernel

    out2 = pl.pallas_call(
        kernel,
        out_shape=jax.ShapeDtypeStruct((B, S2, D2), cdtype),
        grid_spec=pltpu.PrefetchScalarGridSpec(
            num_scalar_prefetch=0,
            grid=grid,
            in_specs=in_specs,
            out_specs=pl.BlockSpec((B, tile_s, D2), lambda i: (0, i, 0)),
        ),
        compiler_params=pltpu.CompilerParams(
            # Grid steps are independent -> allow v7x megacore sharding.
            dimension_semantics=("parallel",),
        ),
    )(*inputs)

    if mode == "fold":
        out_t = out2.reshape(B, S, D)
    elif mode == "pad":
        out_t = out2[:, :, :D]
    else:
        out_t = out2
    return jnp.transpose(out_t, (1, 0, 2))


# --------------------------------------------------- parameter construction ---

def make_pe_table(max_len, d_model):
    """Sinusoidal table, identical to the PyTorch __init__ math. Shape (max_len, D).
    (The PyTorch buffer is (max_len, 1, D); the singleton batch axis is reintroduced
    by broadcasting inside the kernel.)"""
    position = jnp.arange(max_len, dtype=jnp.float32)[:, None]            # (L, 1)
    div_term = jnp.exp(
        jnp.arange(0, d_model, 2, dtype=jnp.float32) * (-math.log(10000.0) / d_model)
    )                                                                     # (D/2,)
    angles = position * div_term                                          # (L, D/2)
    pe = jnp.zeros((max_len, d_model), dtype=jnp.float32)
    pe = pe.at[:, 0::2].set(jnp.sin(angles))
    pe = pe.at[:, 1::2].set(jnp.cos(angles))
    return pe


# -------------------------------------------------------------------- main ---

if __name__ == "__main__":
    dropout_p = 0.1
    max_len = 64

    # Two small configs:
    #   d_model=128 -> lane-dense as-is,
    #   d_model=32  -> wrapper folds 4 seq rows into the lane axis to reach 128 lanes.
    for (S, B, D) in [(8, 2, 128), (8, 2, 32)]:
        key = jax.random.PRNGKey(0)
        kx, km = jax.random.split(key)
        x = jax.random.normal(kx, (S, B, D), dtype=jnp.float32)
        pe = make_pe_table(max_len, D)
        ref = x + pe[:S][:, None, :]

        # Eval mode: dropout is identity -> deterministic check vs reference.
        out_eval = jax.block_until_ready(
            positional_encoding_forward(x, pe, dropout_p=dropout_p, train=False))
        assert out_eval.shape == (S, B, D)
        assert jnp.allclose(out_eval, ref, atol=1e-6, rtol=1e-6), "eval-mode mismatch"

        # Train mode: inverted dropout with an explicit keep mask (exact check).
        keep = jax.random.bernoulli(km, 1.0 - dropout_p, (S, B, D))
        out_train = jax.block_until_ready(
            positional_encoding_forward(x, pe, dropout_p=dropout_p, train=True,
                                        keep_mask=keep))
        ref_train = jnp.where(keep, ref / (1.0 - dropout_p), 0.0)
        assert out_train.shape == (S, B, D)
        assert jnp.allclose(out_train, ref_train, atol=1e-5, rtol=1e-5), \
            "train-mode mismatch"

    print("KERNEL_OK")
</pallas_src>

<mosaic_0001>
module attributes {stable_mosaic.version = 11 : i64} {
  func.func @_pe_add_kernel(%arg0: i32, %arg1: memref<2x8x128xf32, #tpu.memory_space<vmem>>, %arg2: memref<8x128xf32, #tpu.memory_space<vmem>>, %arg3: memref<2x8x128xf32, #tpu.memory_space<vmem>>) attributes {dimension_semantics = [#tpu.dimension_semantics<parallel>], iteration_bounds = array<i64: 1>, scalar_prefetch = 0 : i64, scratch_operands = 0 : i64, tpu.core_type = #tpu.core_type<tc>, window_params = [{transform_indices = @transform_0, window_bounds = array<i64: 2, 8, 128>}, {transform_indices = @transform_1, window_bounds = array<i64: 8, 128>}, {transform_indices = @transform_2, window_bounds = array<i64: 2, 8, 128>}]} {
    %c0 = arith.constant 0 : index
    %c0_0 = arith.constant 0 : index
    %c0_1 = arith.constant 0 : index
    %0 = vector.load %arg1[%c0, %c0_0, %c0_1] : memref<2x8x128xf32, #tpu.memory_space<vmem>>, vector<2x8x128xf32>
    %c0_2 = arith.constant 0 : index
    %c0_3 = arith.constant 0 : index
    %1 = vector.load %arg2[%c0_2, %c0_3] : memref<8x128xf32, #tpu.memory_space<vmem>>, vector<8x128xf32>
    %2 = vector.shape_cast %1 : vector<8x128xf32> to vector<1x8x128xf32>
    %3 = vector.broadcast %2 : vector<1x8x128xf32> to vector<2x8x128xf32>
    %4 = arith.addf %0, %3 : vector<2x8x128xf32>
    %c0_4 = arith.constant 0 : index
    %c0_5 = arith.constant 0 : index
    %c0_6 = arith.constant 0 : index
    %5 = vector.load %arg3[%c0_4, %c0_5, %c0_6] : memref<2x8x128xf32, #tpu.memory_space<vmem>>, vector<2x8x128xf32>
    tpu.vector_store %arg3[%c0_4, %c0_5, %c0_6], %4 {strides = array<i32>} : memref<2x8x128xf32, #tpu.memory_space<vmem>>, vector<2x8x128xf32>,
    return
  }
  func.func @transform_0(%arg0: i32) -> (i32, i32, i32) {
    %c0_i32 = arith.constant 0 : i32
    %c0_i32_0 = arith.constant 0 : i32
    %c0_i32_1 = arith.constant 0 : i32
    return %c0_i32, %arg0, %c0_i32_0 : i32, i32, i32
  }
  func.func @transform_1(%arg0: i32) -> (i32, i32) {
    %c0_i32 = arith.constant 0 : i32
    %c0_i32_0 = arith.constant 0 : i32
    return %arg0, %c0_i32 : i32, i32
  }
  func.func @transform_2(%arg0: i32) -> (i32, i32, i32) {
    %c0_i32 = arith.constant 0 : i32
    %c0_i32_0 = arith.constant 0 : i32
    %c0_i32_1 = arith.constant 0 : i32
    return %c0_i32, %arg0, %c0_i32_0 : i32, i32, i32
  }
}

</mosaic_0001>

<bundles_post_ra>
// kernel: tpu_custom_call.1
= control target key start
LH: loop header
LB: loop body
LE: loop exit
PB: predicated region body
PF: predicated region fallthrough
CT: control target
= control target key end

     0   :  { %7 = vsyncpa [#allocation3], 0  ;;  %s202_s0 = inlined_call_operand.hbm [shape: f32[2,8,128], index: 0, kind: input, shape index: {}]   ;;  %s203_s1 = inlined_call_operand.hbm [shape: f32[8,128], index: 1, kind: input, shape index: {}]   ;;  %s204_s2 = inlined_call_operand.hbm [shape: f32[2,8,128], index: 2, kind: output, shape index: {}]  }
   0x1   :  { %8 = vsyncpa [#allocation6], 0 }
   0x2   :  { %9 = vsyncpa [#allocation4], 0  ;;  %s140_s9 = smov [#allocation2]   ;;  %s68_s13 = scalar_lea.hbm %s202_s0, 256 }
   0x3   :  { %s15_s10 = sshll.u32 %s140_s9, 4  ;;  %p69_p0 = scmp.ne.s32.totalorder %s202_s0, %s68_s13  ;;  %s16_s10 = int_to_ptr.vmem [resolvable:$true] %s15_s10 }
   0x4   :  { %p72_p1 = scmp.lt.u32.totalorder %s68_s13, %s202_s0 }
   0x6   :  { %p74_p2 = pnand %p72_p1, %p69_p0 }
   0x8   :  { %77 = shalt.err (!%p74_p2)
}
   0x9   :  { %s78_s18 = scalar_lea.vmem %s16_s10, 256  ;;  %p83_p4 = scmp.lt.s32.totalorder %s16_s10, %s16_s10 }
   0xa   :  { %p79_p3 = scmp.ne.s32.totalorder %s16_s10, %s78_s18  ;;  %p84_p5 = scmp.lt.s32.totalorder %s78_s18, %s78_s18 }
   0xc   :  { %p85_p6 = por %p84_p5, %p83_p4 }
   0xe   :  { %p86_p7 = pnand %p85_p6, %p79_p3 }
  0x10   :  { %89 = shalt.err (!%p86_p7)
}
  0x11   :  { %s141_s19 = smov 128   ;;  %s142_s20 = smov 8  }
  0x12   :  { %21 = dma.hbm_to_vmem [thread:$0]  %s202_s0, 256, %s16_s10, [#allocation3], %s141_s19, %s141_s19, %s142_s20  }
  0x13   :  { %s143_s23 = smov [#allocation5]   ;;  %s90_s27 = scalar_lea.hbm %s203_s1, 128 }
  0x14   :  { %s28_s24 = sshll.u32 %s143_s23, 4  ;;  %p91_p8 = scmp.ne.s32.totalorder %s203_s1, %s90_s27  ;;  %s29_s24 = int_to_ptr.vmem [resolvable:$true] %s28_s24 }
  0x15   :  { %p94_p9 = scmp.lt.u32.totalorder %s90_s27, %s203_s1 }
  0x17   :  { %p96_p10 = pnand %p94_p9, %p91_p8 }
  0x19   :  { %99 = shalt.err (!%p96_p10)
}
  0x1a   :  { %s100_s4 = scalar_lea.vmem %s29_s24, 128  ;;  %p105_p12 = scmp.lt.s32.totalorder %s29_s24, %s29_s24 }
  0x1b   :  { %p101_p11 = scmp.ne.s32.totalorder %s29_s24, %s100_s4  ;;  %p106_p13 = scmp.lt.s32.totalorder %s100_s4, %s100_s4 }
  0x1d   :  { %p107_p0 = por %p106_p13, %p105_p12 }
  0x1f   :  { %p108_p1 = pnand %p107_p0, %p101_p11 }
  0x21   :  { %111 = shalt.err (!%p108_p1)
}
  0x22   :  { %31 = dma.hbm_to_vmem [thread:$0]  %s203_s1, 128, %s29_s24, [#allocation6]  }
  0x23   :  { %134 = dma.done.wait [#allocation3], 256  }
  0x24   :  { %135 = vsyncadd [#allocation3], 4294967040 }
  0x25   :  { %136 = dma.done.wait [#allocation6], 128  }
  0x26   :  { %137 = vsyncadd [#allocation6], 4294967168  ;;  %s144_s6 = smov [#allocation7]   ;;  %v38_v0 = vld [vmem:[#allocation2] sm:$0xff]  ;;  %v40_v1 = vld [vmem:[#allocation5] sm:$0xff] }
  0x27   :  { %s50_s7 = sshll.u32 %s144_s6, 4  ;;  %v39_v2 = vld [vmem:[#allocation2 + $0x8] sm:$0xff]  ;;  %v41_v3 = vadd.f32 %v40_v1, %v38_v0  ;;  %s51_s7 = int_to_ptr.vmem [resolvable:$true] %s50_s7 }
  0x28   :  { %v42_v4 = vadd.f32 %v40_v1, %v39_v2  ;;  %s112_s8 = scalar_lea.vmem %s51_s7, 256  ;;  %p117_p3 = scmp.lt.s32.totalorder %s51_s7, %s51_s7 }
  0x29   :  { %43 = vst [vmem:[#allocation7] sm:$0xff] %v41_v3  ;;  %p113_p2 = scmp.ne.s32.totalorder %s51_s7, %s112_s8  ;;  %p118_p4 = scmp.lt.s32.totalorder %s112_s8, %s112_s8 }
  0x2a   :  { %44 = vst [vmem:[#allocation7 + $0x8] sm:$0xff] %v42_v4 }
  0x2b   :  { %p119_p5 = por %p118_p4, %p117_p3 }
  0x2d   :  { %p120_p6 = pnand %p119_p5, %p113_p2 }
  0x2f   :  { %123 = shalt.err (!%p120_p6)
}
  0x30   :  { %s124_s10 = scalar_lea.hbm %s204_s2, 256 }
  0x31   :  { %p125_p7 = scmp.ne.s32.totalorder %s204_s2, %s124_s10  ;;  %p128_p8 = scmp.lt.u32.totalorder %s124_s10, %s204_s2 }
  0x33   :  { %p130_p9 = pnand %p128_p8, %p125_p7 }
  0x35   :  { %133 = shalt.err (!%p130_p9)
}
  0x36   :  { %56 = dma.vmem_to_hbm [thread:$0]  %s51_s7, 256, %s204_s2, [#allocation4], %s141_s19, %s141_s19, %s142_s20  }
  0x37   :  { %138 = dma.done.wait [#allocation4], 256  }
  0x38   :  { %139 = vsyncadd [#allocation4], 4294967040 }
  0x39   :  { %60 = vsyncpa [#allocation3], 1 }
  0x3a   :  { %61 = vsyncpa [#allocation6], 1 }
  0x3b   :  { %62 = vsyncpa [#allocation4], 1 }

</bundles_post_ra>
